<compile_context>
chip_gen: v5e
topology: v5e:2x2
jax: 0.10.0
libtpu: 0.0.40
codegen_flags: <defaults>
</compile_context>

<pallas_src>
import functools

import jax
import jax.numpy as jnp
from jax.experimental import pallas as pl
from jax.experimental.pallas import tpu as pltpu


# ---------------------------------------------------------------------------
# Kernels
# ---------------------------------------------------------------------------

def _label_smoothing_row_kernel(x_ref, t_ref, loss_ref, *, ignore_index,
                                label_smoothing):
    """Single-pass path: one block spans the full class dimension."""
    x = x_ref[...]                                           # (TN, C) native
    t = t_ref[...]                                           # (TN, 1) int32
    tn, num_classes = x.shape

    # Row max and target gather in the NATIVE dtype (both bit-exact; packed
    # bf16 runs at 2x the f32 VALU rate on v6e/v7x).
    m = jnp.max(x, axis=-1, keepdims=True)                   # (TN, 1) native
    col = jax.lax.broadcasted_iota(jnp.int32, (1, num_classes), 1)   # (1, C)
    x_t = jnp.sum(jnp.where(col == t, x, jnp.zeros((), x.dtype)),
                  axis=-1, keepdims=True)                    # (TN, 1) native

    # exp / lse path in f32 for accuracy.
    m32 = m.astype(jnp.float32)
    z = x.astype(jnp.float32) - m32                          # (TN, C) f32
    lse = jnp.log(jnp.sum(jnp.exp(z), axis=-1, keepdims=True))       # (TN, 1)
    sum_z = jnp.sum(z, axis=-1, keepdims=True)                        # (TN, 1)
    z_t = x_t.astype(jnp.float32) - m32                               # (TN, 1)

    eps = label_smoothing
    # loss = -[(1-eps) * log_p[target] + (eps/C) * sum_c log_p[c]]
    loss = -((1.0 - eps) * (z_t - lse)
             + (eps / num_classes) * (sum_z - num_classes * lse))
    loss_ref[...] = jnp.where(t == ignore_index, 0.0, loss)


def _label_smoothing_ctile_kernel(x_ref, t_ref, loss_ref,
                                  m_sc, l_sc, sx_sc, xt_sc, *,
                                  ignore_index, label_smoothing,
                                  num_classes, class_tile):
    """Fallback path for huge C: online max/sum over class tiles."""
    k = pl.program_id(1)

    @pl.when(k == 0)
    def _():
        m_sc[...] = jnp.full_like(m_sc, -jnp.inf)
        l_sc[...] = jnp.zeros_like(l_sc)
        sx_sc[...] = jnp.zeros_like(sx_sc)
        xt_sc[...] = jnp.zeros_like(xt_sc)

    x = x_ref[...]                                           # (TN, TC) native
    t = t_ref[...]                                           # (TN, 1) int32
    tn, tc = x.shape

    col = jax.lax.broadcasted_iota(jnp.int32, (1, tc), 1) + k * class_tile

    # Target gather in the native dtype (bit-exact: at most one non-zero lane).
    xt_sc[...] += jnp.sum(
        jnp.where(col == t, x, jnp.zeros((), x.dtype)),
        axis=-1, keepdims=True).astype(jnp.float32)

    x32 = x.astype(jnp.float32)
    if num_classes % class_tile != 0:
        # Tail class-block contains garbage columns; mask them out of the
        # reductions (static flag, only costs when C is not tile-aligned).
        valid = col < num_classes                            # (1, TC)
        x32_max = jnp.where(valid, x32, -jnp.inf)
        x32_sum = jnp.where(valid, x32, 0.0)
    else:
        x32_max = x32
        x32_sum = x32

    m_tile = jnp.max(x32_max, axis=-1, keepdims=True)        # (TN, 1)
    m_prev = m_sc[...]
    m_new = jnp.maximum(m_prev, m_tile)
    l_sc[...] = (l_sc[...] * jnp.exp(m_prev - m_new)
                 + jnp.sum(jnp.exp(x32_max - m_new), axis=-1, keepdims=True))
    m_sc[...] = m_new
    sx_sc[...] += jnp.sum(x32_sum, axis=-1, keepdims=True)

    @pl.when(k == pl.num_programs(1) - 1)
    def _():
        lse = m_sc[...] + jnp.log(l_sc[...])                 # (TN, 1)
        eps = label_smoothing
        c = num_classes
        # sum_c log_p[c] = sum_x - C*lse ;  log_p[target] = x_t - lse
        loss = -((1.0 - eps) * (xt_sc[...] - lse)
                 + (eps / c) * (sx_sc[...] - c * lse))
        loss_ref[...] = jnp.where(t == ignore_index, 0.0, loss)


# ---------------------------------------------------------------------------
# Tiling heuristics
# ---------------------------------------------------------------------------

def _vmem_limit_bytes() -> int:
    """Generation-aware scoped-VMEM limit (v7x has 64 MiB, v5e/v6e 128 MiB)."""
    try:
        cap = int(pltpu.get_tpu_info().vmem_capacity_bytes)
    except Exception:
        cap = 64 * 1024 * 1024                               # conservative
    limit = min(cap - 16 * 1024 * 1024, 112 * 1024 * 1024)
    return max(limit, 32 * 1024 * 1024)


def _row_alignment(itemsize: int) -> int:
    """Packed-sublane row granularity: 8 for f32, 16 for bf16, 32 for int8."""
    return max(8, (8 * 4) // max(1, itemsize))


def _choose_tiles(n: int, c: int, itemsize: int, vmem_limit: int):
    """Return (row_tile, class_tile_or_None)."""
    align = _row_alignment(itemsize)
    budget = int(vmem_limit * 0.6)                           # compiler headroom
    # Live VMEM per row (single-pass path): double-buffered native input tile
    # plus ~3 full-width f32-equivalents of temporaries (z, exp(z), select).
    per_row = c * (2 * itemsize + 3 * 4) + 128
    tn = budget // per_row
    if tn >= align:
        tn = (tn // align) * align
        tn = min(tn, 1024)                    # >~0.5-4 MiB tiles: no BW gain
        if n > 8 * align:
            # Keep the grid >= ~8 steps so the DMA pipeline overlaps and the
            # single "parallel" axis can shard across both v7x TensorCores.
            tn = min(tn, max(align, ((n // 8) // align) * align))
        tn = min(tn, ((n + align - 1) // align) * align)     # never exceed rows
        return max(tn, align), None
    # Huge C: even the minimal row tile does not fit -> tile the class dim.
    tn = align
    per_elem = 2 * itemsize + 4 * 4
    tc = budget // (tn * per_elem)
    tc = max(128, (tc // 128) * 128)
    tc = min(tc, ((c + 127) // 128) * 128)
    return tn, tc


# ---------------------------------------------------------------------------
# Module wrapper
# ---------------------------------------------------------------------------

class LabelSmoothingLoss:
    """JAX/Pallas port of icefall's LabelSmoothingLoss forward pass."""

    def __init__(self, ignore_index: int = -1, label_smoothing: float = 0.1,
                 reduction: str = "sum", _row_tile: int | None = None,
                 _class_tile: int | None = None) -> None:
        assert 0.0 <= label_smoothing < 1.0, f"{label_smoothing}"
        assert reduction in ("none", "sum", "mean"), reduction
        self.ignore_index = ignore_index
        self.label_smoothing = label_smoothing
        self.reduction = reduction
        self._row_tile = _row_tile            # test hooks: force tile sizes
        self._class_tile = _class_tile

    def __call__(self, x: jax.Array, target: jax.Array) -> jax.Array:
        assert x.ndim == 3
        assert target.ndim == 2
        assert x.shape[:2] == target.shape
        num_classes = x.shape[-1]

        n = x.shape[0] * x.shape[1]
        # Keep logits in their native dtype (bf16 halves HBM traffic); the
        # kernel only upcasts the exp/lse path to f32.
        x2 = x.reshape(n, num_classes)
        t2 = target.reshape(n, 1).astype(jnp.int32)

        vmem_limit = _vmem_limit_bytes()
        tn_auto, tc_auto = _choose_tiles(n, num_classes, x2.dtype.itemsize,
                                         vmem_limit)
        tn = self._row_tile if self._row_tile is not None else tn_auto
        tc = self._class_tile if self._class_tile is not None else tc_auto
        nblocks = pl.cdiv(n, tn)

        cost = pl.CostEstimate(
            flops=7 * n * num_classes,
            transcendentals=n * num_classes,
            bytes_accessed=n * num_classes * x2.dtype.itemsize + 2 * n * 4,
        )

        if tc is None:
            kernel = functools.partial(
                _label_smoothing_row_kernel,
                ignore_index=self.ignore_index,
                label_smoothing=self.label_smoothing,
            )
            row_loss = pl.pallas_call(
                kernel,
                out_shape=jax.ShapeDtypeStruct((n, 1), jnp.float32),
                grid_spec=pltpu.PrefetchScalarGridSpec(
                    num_scalar_prefetch=0,
                    grid=(nblocks,),
                    in_specs=[
                        pl.BlockSpec((tn, num_classes), lambda i: (i, 0)),
                        pl.BlockSpec((tn, 1), lambda i: (i, 0)),
                    ],
                    out_specs=pl.BlockSpec((tn, 1), lambda i: (i, 0)),
                ),
                compiler_params=pltpu.CompilerParams(
                    dimension_semantics=("parallel",),
                    vmem_limit_bytes=vmem_limit,
                ),
                cost_estimate=cost,
            )(x2, t2)
        else:
            ncb = pl.cdiv(num_classes, tc)
            kernel = functools.partial(
                _label_smoothing_ctile_kernel,
                ignore_index=self.ignore_index,
                label_smoothing=self.label_smoothing,
                num_classes=num_classes,
                class_tile=tc,
            )
            row_loss = pl.pallas_call(
                kernel,
                out_shape=jax.ShapeDtypeStruct((n, 1), jnp.float32),
                grid_spec=pltpu.PrefetchScalarGridSpec(
                    num_scalar_prefetch=0,
                    grid=(nblocks, ncb),
                    in_specs=[
                        pl.BlockSpec((tn, tc), lambda i, k: (i, k)),
                        pl.BlockSpec((tn, 1), lambda i, k: (i, 0)),
                    ],
                    out_specs=pl.BlockSpec((tn, 1), lambda i, k: (i, 0)),
                    scratch_shapes=[pltpu.VMEM((tn, 1), jnp.float32)] * 4,
                ),
                compiler_params=pltpu.CompilerParams(
                    dimension_semantics=("parallel", "arbitrary"),
                    vmem_limit_bytes=vmem_limit,
                ),
                cost_estimate=cost,
            )(x2, t2)

        row_loss = row_loss[:, 0]                            # (N,)

        if self.reduction == "sum":
            return jnp.sum(row_loss)
        elif self.reduction == "mean":
            # Matches PyTorch: if every target is ignored this is inf/nan.
            n_valid = jnp.sum(target.reshape(-1) != self.ignore_index)
            return jnp.sum(row_loss) / n_valid
        else:
            return row_loss


# ---------------------------------------------------------------------------
# Reference + tests
# ---------------------------------------------------------------------------

def _reference(x, target, ignore_index, label_smoothing, reduction):
    """Pure-JAX reference mirroring the PyTorch code, for validation."""
    num_classes = x.shape[-1]
    x = x.reshape(-1, num_classes).astype(jnp.float32)
    target = target.reshape(-1)
    ignored = target == ignore_index
    target = jnp.where(ignored, 0, target)
    true_dist = jax.nn.one_hot(target, num_classes, dtype=x.dtype)
    true_dist = true_dist * (1.0 - label_smoothing) + label_smoothing / num_classes
    true_dist = jnp.where(ignored[:, None], 0.0, true_dist)
    loss = -(jax.nn.log_softmax(x, axis=1) * true_dist)
    if reduction == "sum":
        return loss.sum()
    elif reduction == "mean":
        return loss.sum() / jnp.sum(~ignored)
    else:
        return loss.sum(axis=-1)


if __name__ == "__main__":
    key = jax.random.PRNGKey(0)

    # Test 1: small canonical shapes, all three reductions, single-pass path.
    kx, kt, km = jax.random.split(key, 3)
    batch, seq, num_classes = 2, 8, 32
    x = jax.random.normal(kx, (batch, seq, num_classes), dtype=jnp.float32)
    target = jax.random.randint(kt, (batch, seq), 0, num_classes, dtype=jnp.int32)
    mask = jax.random.bernoulli(km, 0.25, (batch, seq))
    target = jnp.where(mask, -1, target)

    for reduction in ("sum", "mean", "none"):
        loss_fn = LabelSmoothingLoss(ignore_index=-1, label_smoothing=0.1,
                                     reduction=reduction)
        out = loss_fn(x, target)
        jax.block_until_ready(out)
        ref = _reference(x, target, -1, 0.1, reduction)
        assert jnp.allclose(out, ref, rtol=1e-5, atol=1e-5), (reduction, out, ref)

    # Test 2: row count not a multiple of the tile (partial tail row block).
    kx2, kt2, km2 = jax.random.split(jax.random.PRNGKey(1), 3)
    batch2, seq2, num_classes2 = 2, 13, 40
    x2 = jax.random.normal(kx2, (batch2, seq2, num_classes2), dtype=jnp.float32)
    target2 = jax.random.randint(kt2, (batch2, seq2), 0, num_classes2,
                                 dtype=jnp.int32)
    mask2 = jax.random.bernoulli(km2, 0.25, (batch2, seq2))
    target2 = jnp.where(mask2, -1, target2)

    loss_fn2 = LabelSmoothingLoss(ignore_index=-1, label_smoothing=0.1,
                                  reduction="sum", _row_tile=8)
    out2 = loss_fn2(x2, target2)
    jax.block_until_ready(out2)
    ref2 = _reference(x2, target2, -1, 0.1, "sum")
    assert jnp.allclose(out2, ref2, rtol=1e-5, atol=1e-5), (out2, ref2)

    # Test 3: bf16 logits exercise the native-dtype max/gather path.
    kx3, kt3, km3 = jax.random.split(jax.random.PRNGKey(2), 3)
    batch3, seq3, num_classes3 = 2, 8, 512
    x3 = jax.random.normal(kx3, (batch3, seq3, num_classes3),
                           dtype=jnp.float32).astype(jnp.bfloat16)
    target3 = jax.random.randint(kt3, (batch3, seq3), 0, num_classes3,
                                 dtype=jnp.int32)
    mask3 = jax.random.bernoulli(km3, 0.25, (batch3, seq3))
    target3 = jnp.where(mask3, -1, target3)

    for reduction in ("sum", "none"):
        loss_fn3 = LabelSmoothingLoss(ignore_index=-1, label_smoothing=0.1,
                                      reduction=reduction)
        out3 = loss_fn3(x3, target3)
        jax.block_until_ready(out3)
        ref3 = _reference(x3, target3, -1, 0.1, reduction)
        assert jnp.allclose(out3, ref3, rtol=1e-3, atol=1e-3), (reduction, out3, ref3)

    # Test 4: forced class-tiled fallback path (online max/sum accumulators),
    # with a non-tile-aligned class count (exercises the tail-column masking)
    # and bf16 logits.
    kx4, kt4, km4 = jax.random.split(jax.random.PRNGKey(3), 3)
    batch4, seq4, num_classes4 = 2, 13, 640
    x4 = jax.random.normal(kx4, (batch4, seq4, num_classes4),
                           dtype=jnp.float32).astype(jnp.bfloat16)
    target4 = jax.random.randint(kt4, (batch4, seq4), 0, num_classes4,
                                 dtype=jnp.int32)
    mask4 = jax.random.bernoulli(km4, 0.25, (batch4, seq4))
    target4 = jnp.where(mask4, -1, target4)

    loss_fn4 = LabelSmoothingLoss(ignore_index=-1, label_smoothing=0.1,
                                  reduction="sum", _row_tile=8, _class_tile=256)
    out4 = loss_fn4(x4, target4)
    jax.block_until_ready(out4)
    ref4 = _reference(x4, target4, -1, 0.1, "sum")
    assert jnp.allclose(out4, ref4, rtol=1e-3, atol=1e-3), (out4, ref4)

    print("KERNEL_OK")
</pallas_src>

<mosaic_0001>
module attributes {stable_mosaic.version = 11 : i64} {
  func.func @_label_smoothing_row_kernel(%arg0: i32, %arg1: memref<16x32xf32, #tpu.memory_space<vmem>>, %arg2: memref<16x1xi32, #tpu.memory_space<vmem>>, %arg3: memref<16x1xf32, #tpu.memory_space<vmem>>) attributes {dimension_semantics = [#tpu.dimension_semantics<parallel>], iteration_bounds = array<i64: 1>, scalar_prefetch = 0 : i64, scratch_operands = 0 : i64, tpu.core_type = #tpu.core_type<tc>, window_params = [{transform_indices = @transform_0, window_bounds = array<i64: 16, 32>}, {transform_indices = @transform_1, window_bounds = array<i64: 16, 1>}, {transform_indices = @transform_2, window_bounds = array<i64: 16, 1>}]} {
    %c0 = arith.constant 0 : index
    %c0_0 = arith.constant 0 : index
    %0 = vector.load %arg1[%c0, %c0_0] : memref<16x32xf32, #tpu.memory_space<vmem>>, vector<16x32xf32>
    %c0_1 = arith.constant 0 : index
    %c0_2 = arith.constant 0 : index
    %1 = vector.load %arg2[%c0_1, %c0_2] : memref<16x1xi32, #tpu.memory_space<vmem>>, vector<16x1xi32>
    %cst = arith.constant dense<0xFF800000> : vector<16xf32>
    %2 = vector.multi_reduction <maximumf>, %0, %cst [1] : vector<16x32xf32> to vector<16xf32>
    %3 = vector.shape_cast %2 : vector<16xf32> to vector<16x1xf32>
    %4 = tpu.iota {dimensions = array<i32: 1>} : vector<1x32xi32>
    %5 = vector.broadcast %4 : vector<1x32xi32> to vector<16x32xi32>
    %6 = vector.broadcast %1 : vector<16x1xi32> to vector<16x32xi32>
    %7 = arith.cmpi eq, %5, %6 : vector<16x32xi32>
    %cst_3 = arith.constant 0.000000e+00 : f32
    %8 = vector.broadcast %cst_3 : f32 to vector<16x32xf32>
    %9 = arith.select %7, %0, %8 : vector<16x32xi1>, vector<16x32xf32>
    %cst_4 = arith.constant dense<0.000000e+00> : vector<16xf32>
    %10 = vector.multi_reduction <add>, %9, %cst_4 [1] : vector<16x32xf32> to vector<16xf32>
    %11 = vector.shape_cast %10 : vector<16xf32> to vector<16x1xf32>
    %12 = vector.broadcast %3 : vector<16x1xf32> to vector<16x32xf32>
    %13 = arith.subf %0, %12 : vector<16x32xf32>
    %14 = math.exp %13 : vector<16x32xf32>
    %cst_5 = arith.constant dense<0.000000e+00> : vector<16xf32>
    %15 = vector.multi_reduction <add>, %14, %cst_5 [1] : vector<16x32xf32> to vector<16xf32>
    %16 = vector.shape_cast %15 : vector<16xf32> to vector<16x1xf32>
    %17 = math.log %16 : vector<16x1xf32>
    %cst_6 = arith.constant dense<0.000000e+00> : vector<16xf32>
    %18 = vector.multi_reduction <add>, %13, %cst_6 [1] : vector<16x32xf32> to vector<16xf32>
    %19 = vector.shape_cast %18 : vector<16xf32> to vector<16x1xf32>
    %20 = arith.subf %11, %3 : vector<16x1xf32>
    %21 = arith.subf %20, %17 : vector<16x1xf32>
    %cst_7 = arith.constant 0.899999976 : f32
    %22 = vector.broadcast %cst_7 : f32 to vector<16x1xf32>
    %23 = arith.mulf %22, %21 : vector<16x1xf32>
    %cst_8 = arith.constant 3.200000e+01 : f32
    %24 = vector.broadcast %cst_8 : f32 to vector<16x1xf32>
    %25 = arith.mulf %24, %17 : vector<16x1xf32>
    %26 = arith.subf %19, %25 : vector<16x1xf32>
    %cst_9 = arith.constant 3.125000e-03 : f32
    %27 = vector.broadcast %cst_9 : f32 to vector<16x1xf32>
    %28 = arith.mulf %27, %26 : vector<16x1xf32>
    %29 = arith.addf %23, %28 : vector<16x1xf32>
    %cst_10 = arith.constant 0.000000e+00 : f32
    %30 = vector.broadcast %cst_10 : f32 to vector<16x1xf32>
    %31 = arith.subf %30, %29 : vector<16x1xf32>
    %c-1_i32 = arith.constant -1 : i32
    %32 = vector.broadcast %c-1_i32 : i32 to vector<16x1xi32>
    %33 = arith.cmpi eq, %1, %32 : vector<16x1xi32>
    %cst_11 = arith.constant 0.000000e+00 : f32
    %34 = vector.broadcast %cst_11 : f32 to vector<16x1xf32>
    %35 = arith.select %33, %34, %31 : vector<16x1xi1>, vector<16x1xf32>
    %c0_12 = arith.constant 0 : index
    %c0_13 = arith.constant 0 : index
    %36 = vector.load %arg3[%c0_12, %c0_13] : memref<16x1xf32, #tpu.memory_space<vmem>>, vector<16x1xf32>
    tpu.vector_store %arg3[%c0_12, %c0_13], %35 {strides = array<i32>} : memref<16x1xf32, #tpu.memory_space<vmem>>, vector<16x1xf32>,
    return
  }
  func.func @transform_0(%arg0: i32) -> (i32, i32) {
    %c0_i32 = arith.constant 0 : i32
    %c0_i32_0 = arith.constant 0 : i32
    return %arg0, %c0_i32 : i32, i32
  }
  func.func @transform_1(%arg0: i32) -> (i32, i32) {
    %c0_i32 = arith.constant 0 : i32
    %c0_i32_0 = arith.constant 0 : i32
    return %arg0, %c0_i32 : i32, i32
  }
  func.func @transform_2(%arg0: i32) -> (i32, i32) {
    %c0_i32 = arith.constant 0 : i32
    %c0_i32_0 = arith.constant 0 : i32
    return %arg0, %c0_i32 : i32, i32
  }
}

</mosaic_0001>

<bundles_post_ra>
// kernel: tpu_custom_call.1
= control target key start
LH: loop header
LB: loop body
LE: loop exit
PB: predicated region body
PF: predicated region fallthrough
CT: control target
= control target key end

     0   :  { %vm15_vm0 = vcmask 261120   ;;  %v100_v0 = vmov 0   ;;  %v22_v7 = vlaneseq  ;;  %vm82_vm4 = vcmask 7168   ;;  %s150_s1 = inlined_call_operand.vmem [shape: s32[16,1], index: 1, kind: input, shape index: {}]   ;;  %s151_s0 = inlined_call_operand.vmem [shape: f32[16,32], index: 0, kind: input, shape index: {}]   ;;  %s152_s2 = inlined_call_operand.vmem [shape: f32[16,1], index: 2, kind: output, shape index: {}]  }
   0x1   :  { %90 = vset.pattern.permute.xlu1 %v100_v0  ;;  %v119_v1 = vld [vmem:[%s150_s1] sm:$0xff]  ;;  %91 = vset.pattern.permute.xlu0 %v100_v0  ;;  %v12_v4 = vld [vmem:[%s151_s0 + $0x8] sm:$0xff] }
   0x2   :  { %v11_v2 = vld [vmem:[%s151_s0] sm:$0xff]  ;;  %25 = vperm.xlu1 %90, %v119_v1   ;;  %v132_v5 = vld [vmem:[%s150_s1 + $0x8] sm:$0xff]  ;;  %v19_v6 = vsel %vm15_vm0, %v12_v4, -inf  ;;  %v23_v8 = vand.u32 127, %v22_v7  ;;  %vm78_vm3 = vcmp.eq.s32.totalorder %v119_v1, 4294967295 }
   0x3   :  { %v16_v3 = vsel %vm15_vm0, %v11_v2, -inf  ;;  %vm79_vm5 = vcmp.eq.s32.totalorder %v132_v5, 4294967295 }
   0x4   :  { %17 = vmax.xlane.f32.xlu0 %v16_v3 }
   0xa   :  { %28 = vperm.xlu1 %90, %v132_v5  }
   0xc   :  { %20 = vmax.xlane.f32.xlu0 %v19_v6 }
  0x74   :  { %v26_v9 = vpop.permute.xlu1 %25 }
  0x75   :  { %vm30_vm1 = vcmp.eq.s32.totalorder %v23_v8, %v26_v9 }
  0x76   :  { %v32_v11 = vsel %vm30_vm1, %v11_v2, 0.0 }
  0x77   :  { %v18_v10 = vpop.xlane.xlu0 %17  ;;  %v34_v13 = vsel %vm15_vm0, %v32_v11, 0.0 }
  0x78   :  { %v40_v12 = vsub.f32 %v11_v2, %v18_v10  ;;  %35 = vadd.xlane.f32.xlu0 %v34_v13 }
  0x7a   :  { %v42_v14 = vmul.f32 1.442695, %v40_v12  ;;  %v56_v26 = vsel %vm15_vm0, %v40_v12, 0.0 }
  0x7c   :  { %92 = vpow2.f32 %v42_v14  ;;  %v29_v15 = vpop.permute.xlu1 %28 }
  0x7d   :  { %vm31_vm2 = vcmp.eq.s32.totalorder %v23_v8, %v29_v15 }
  0x7e   :  { %v33_v17 = vsel %vm31_vm2, %v12_v4, 0.0 }
  0x7f   :  { %v21_v16 = vpop.xlane.xlu0 %20  ;;  %v37_v19 = vsel %vm15_vm0, %v33_v17, 0.0 }
  0x80   :  { %v41_v18 = vsub.f32 %v12_v4, %v21_v16  ;;  %38 = vadd.xlane.f32.xlu1 %v37_v19 }
  0x82   :  { %v93_v20 = vpop.eup %92  ;;  %v44_v21 = vmul.f32 1.442695, %v41_v18  ;;  %v59_v22 = vsel %vm15_vm0, %v41_v18, 0.0 }
  0x83   :  { %60 = vadd.xlane.f32.xlu0 %v59_v22  ;;  %v46_v23 = vsel %vm15_vm0, %v93_v20, 0.0 }
  0x84   :  { %94 = vpow2.f32 %v44_v21  ;;  %47 = vadd.xlane.f32.xlu2 %v46_v23 }
  0x8a   :  { %v95_v24 = vpop.eup %94 }
  0x8b   :  { %v49_v25 = vsel %vm15_vm0, %v95_v24, 0.0 }
  0x8c   :  { %50 = vadd.xlane.f32.xlu2 %v49_v25 }
  0x94   :  { %57 = vadd.xlane.f32.xlu2 %v56_v26 }
  0xeb   :  { %v36_v30 = vpop.xlane.xlu0 %35 }
  0xec   :  { %v62_v32 = vsub.f32 %v36_v30, %v18_v10 }
  0xf3   :  { %v39_v33 = vpop.xlane.xlu1 %38 }
  0xf4   :  { %v63_v37 = vsub.f32 %v39_v33, %v21_v16 }
  0xf6   :  { %v61_v43 = vpop.xlane.xlu0 %60 }
  0xf7   :  { %v48_v27 = vpop.xlane.xlu2 %47 }
  0xf8   :  { %96 = vlog2.f32 %v48_v27 }
  0xfe   :  { %v97_v28 = vpop.eup %96 }
  0xff   :  { %v51_v29 = vpop.xlane.xlu2 %50  ;;  %v53_v31 = vmul.f32 0.6931472, %v97_v28 }
 0x100   :  { %98 = vlog2.f32 %v51_v29 }
 0x101   :  { %v64_v35 = vsub.f32 %v62_v32, %v53_v31  ;;  %v68_v36 = vmul.f32 32.0, %v53_v31 }
 0x103   :  { %v66_v44 = vmul.f32 0.9, %v64_v35 }
 0x106   :  { %v99_v34 = vpop.eup %98 }
 0x107   :  { %v55_v38 = vmul.f32 0.6931472, %v99_v34  ;;  %v58_v39 = vpop.xlane.xlu2 %57 }
 0x108   :  { %v70_v40 = vsub.f32 %v58_v39, %v68_v36 }
 0x109   :  { %v65_v41 = vsub.f32 %v63_v37, %v55_v38  ;;  %v69_v42 = vmul.f32 32.0, %v55_v38 }
 0x10a   :  { %v72_v45 = vmul.f32 0.003125, %v70_v40 }
 0x10b   :  { %v71_v46 = vsub.f32 %v61_v43, %v69_v42  ;;  %v67_v48 = vmul.f32 0.9, %v65_v41 }
 0x10c   :  { %v74_v47 = vadd.f32 %v72_v45, %v66_v44 }
 0x10d   :  { %v73_v49 = vmul.f32 0.003125, %v71_v46 }
 0x10e   :  { %v76_v50 = vsub.f32 0.0, %v74_v47 }
 0x10f   :  { %v75_v51 = vadd.f32 %v73_v49, %v67_v48 }
 0x110   :  { %v80_v52 = vsel %vm78_vm3, 0.0, %v76_v50 }
 0x111   :  { %v77_v53 = vsub.f32 0.0, %v75_v51  ;;  %83 = vst.msk [vmem:[%s152_s2] sm:$0xff] %vm82_vm4, %v80_v52 }
 0x113   :  { %v81_v54 = vsel %vm79_vm5, 0.0, %v77_v53 }
 0x114   :  { %84 = vst.msk [vmem:[%s152_s2 + $0x8] sm:$0xff] %vm82_vm4, %v81_v54 }

</bundles_post_ra>
